<compile_context>
chip_gen: v7x
topology: tpu7x:2x2x1
jax: 0.10.0
libtpu: 0.0.40
codegen_flags: <defaults>
</compile_context>

<pallas_src>
import jax
import jax.numpy as jnp
from jax import lax
from jax.experimental import pallas as pl
from jax.experimental.pallas import tpu as pltpu


def _style_encoder_kernel(lengths_ref, x_ref, w_ref, b_ref, o_ref):
    """One grid step = one block of B_BLK batch rows.

    lengths_ref : (B_pad,) int32 in SMEM (scalar prefetch) -- valid token counts
    x_ref       : (B_BLK, T, Hp) bf16   token embeddings (synthetic last_hidden_state in)
    w_ref       : (Hp, Hp)       bf16   dense "encoder" weight (resident)
    b_ref       : (1, Hp)        f32    dense "encoder" bias
    o_ref       : (B_BLK, 1, Hp) f32    pooled embeddings
    """
    b_blk, t, hp = x_ref.shape

    # One big lane-dense MXU matmul covering the whole block (f32 accumulation).
    x = x_ref[...].reshape(b_blk * t, hp)                    # (B_BLK*T, Hp) bf16
    h = jnp.dot(x, w_ref[...], preferred_element_type=jnp.float32)
    h = jnp.tanh(h + b_ref[...])                             # f32 (B_BLK*T, Hp)

    # Masked mean pooling, mask rebuilt from SMEM lengths (no mask tensor DMA).
    b0 = pl.program_id(0) * b_blk
    t_idx = lax.broadcasted_iota(jnp.int32, (t, hp), 0)      # token position per row
    for i in range(b_blk):                                   # static unroll over block rows
        length = lengths_ref[b0 + i]                         # scalar SMEM read
        hi = h[i * t:(i + 1) * t, :]                         # (T, Hp) f32
        num = jnp.sum(jnp.where(t_idx < length, hi, 0.0), axis=0, keepdims=True)  # (1, Hp)
        den = jnp.maximum(length.astype(jnp.float32), 1e-9)  # torch.clamp(min=1e-9)
        o_ref[i] = num / den


def _round_up(x, m):
    return ((x + m - 1) // m) * m


def _pick_b_blk(batch, seq):
    """Aim for >=~256 MXU rows per grid step, but keep >=2 grid steps (v7x megacore)."""
    target_rows = 256
    b_blk = max(1, min(batch, target_rows // max(seq, 1)))
    if batch >= 2:
        b_blk = max(1, min(b_blk, pl.cdiv(batch, 2)))
    return b_blk


def style_encoder_forward(token_emb, attention_mask, w, b, *, b_blk=None):
    """token_emb: (B, T, H) f32, attention_mask: (B, T) {0,1}, w: (H, H), b: (H,)."""
    B, T, H = token_emb.shape
    Hp = _round_up(H, 128)                                   # lane-dense hidden dim

    if b_blk is None:
        b_blk = _pick_b_blk(B, T)
    B_pad = _round_up(B, b_blk)                              # pad batch to block multiple

    # Tokenizer padding masks are contiguous prefixes -> carry them as int lengths in SMEM.
    lengths = attention_mask.astype(jnp.int32).sum(axis=1)
    lengths = jnp.pad(lengths, (0, B_pad - B))               # padded rows: length 0 -> output 0

    # Zero-pad hidden dim (exact: padded weight rows/cols are 0) and cast MXU operands to bf16.
    x = jnp.pad(token_emb.astype(jnp.float32),
                ((0, B_pad - B), (0, 0), (0, Hp - H))).astype(jnp.bfloat16)
    w_p = jnp.pad(w.astype(jnp.float32), ((0, Hp - H), (0, Hp - H))).astype(jnp.bfloat16)
    b_p = jnp.pad(b.astype(jnp.float32), (0, Hp - H)).reshape(1, Hp)

    grid = (B_pad // b_blk,)
    out = pl.pallas_call(
        _style_encoder_kernel,
        out_shape=jax.ShapeDtypeStruct((B_pad, 1, Hp), jnp.float32),
        grid_spec=pltpu.PrefetchScalarGridSpec(
            num_scalar_prefetch=1,                           # lengths -> SMEM
            grid=grid,
            in_specs=[
                pl.BlockSpec((b_blk, T, Hp), lambda i, lens: (i, 0, 0)),
                pl.BlockSpec((Hp, Hp), lambda i, lens: (0, 0)),
                pl.BlockSpec((1, Hp), lambda i, lens: (0, 0)),
            ],
            out_specs=pl.BlockSpec((b_blk, 1, Hp), lambda i, lens: (i, 0, 0)),
        ),
        compiler_params=pltpu.CompilerParams(dimension_semantics=("parallel",)),
    )(lengths, x, w_p, b_p)

    return out.reshape(B_pad, Hp)[:B, :H]


def _reference(token_emb, attention_mask, w, b):
    """Pure-JAX reference mirroring _mean_pooling (and the kernel's bf16-MXU precision)."""
    x = token_emb.astype(jnp.bfloat16)
    wb = w.astype(jnp.bfloat16)
    h = jnp.einsum("bth,hk->btk", x, wb, preferred_element_type=jnp.float32)
    h = jnp.tanh(h + b[None, None, :].astype(jnp.float32))
    mask = attention_mask.astype(jnp.float32)[..., None]     # (B, T, 1)
    num = jnp.sum(h * mask, axis=1)
    den = jnp.maximum(jnp.sum(mask, axis=1), 1e-9)           # torch.clamp(min=1e-9)
    return num / den


if __name__ == "__main__":
    B, T, H, VOCAB = 2, 8, 32, 64  # small shapes; T ~ truncated token sequence, H = hidden

    key = jax.random.PRNGKey(0)
    k_tok, k_emb, k_w, k_b = jax.random.split(key, 4)

    # Deterministic synthetic "tokenizer" output: token ids + padding mask.
    token_ids = jax.random.randint(k_tok, (B, T), 0, VOCAB)
    lengths = jnp.array([T, T // 2], dtype=jnp.int32)        # second sequence is padded
    attention_mask = (jnp.arange(T)[None, :] < lengths[:, None]).astype(jnp.int32)

    # Deterministic synthetic encoder parameters.
    emb_table = jax.random.normal(k_emb, (VOCAB, H), dtype=jnp.float32) * 0.1
    w = jax.random.normal(k_w, (H, H), dtype=jnp.float32) * 0.1
    b = jax.random.normal(k_b, (H,), dtype=jnp.float32) * 0.01

    # Glue: embedding lookup (gather) stays in plain JAX.
    token_emb = emb_table[token_ids]  # (B, T, H)

    pooled = jax.block_until_ready(style_encoder_forward(token_emb, attention_mask, w, b))
    ref = _reference(token_emb, attention_mask, w, b)

    assert pooled.shape == (B, H)
    assert jnp.allclose(pooled, ref, atol=1e-4, rtol=1e-4), \
        float(jnp.max(jnp.abs(pooled - ref)))

    print("KERNEL_OK")
</pallas_src>

<mosaic_0001>
module attributes {stable_mosaic.version = 11 : i64} {
  func.func @_style_encoder_kernel(%arg0: i32, %arg1: memref<2xi32, #tpu.memory_space<smem>>, %arg2: memref<1x8x128xbf16, #tpu.memory_space<vmem>>, %arg3: memref<128x128xbf16, #tpu.memory_space<vmem>>, %arg4: memref<1x128xf32, #tpu.memory_space<vmem>>, %arg5: memref<1x1x128xf32, #tpu.memory_space<vmem>>) attributes {dimension_semantics = [#tpu.dimension_semantics<parallel>], iteration_bounds = array<i64: 2>, scalar_prefetch = 1 : i64, scratch_operands = 0 : i64, tpu.core_type = #tpu.core_type<tc>, window_params = [{transform_indices = @transform_0, window_bounds = array<i64: 1, 8, 128>}, {pipeline_mode = #tpu.pipeline_mode<synchronous>, transform_indices = @transform_1, window_bounds = array<i64: 128, 128>}, {pipeline_mode = #tpu.pipeline_mode<synchronous>, transform_indices = @transform_2, window_bounds = array<i64: 1, 128>}, {transform_indices = @transform_3, window_bounds = array<i64: 1, 1, 128>}]} {
    %c0 = arith.constant 0 : index
    %c0_0 = arith.constant 0 : index
    %c0_1 = arith.constant 0 : index
    %0 = vector.load %arg2[%c0, %c0_0, %c0_1] : memref<1x8x128xbf16, #tpu.memory_space<vmem>>, vector<1x8x128xbf16>
    %1 = vector.shape_cast %0 : vector<1x8x128xbf16> to vector<8x128xbf16>
    %c0_2 = arith.constant 0 : index
    %c0_3 = arith.constant 0 : index
    %2 = vector.load %arg3[%c0_2, %c0_3] : memref<128x128xbf16, #tpu.memory_space<vmem>>, vector<128x128xbf16>
    %cst = arith.constant dense<0.000000e+00> : vector<8x128xf32>
    %3 = tpu.matmul %1, %2, %cst {dimension_numbers = #tpu.dot_dimension_numbers<[1], [0], [0], [1], [0, 0, 1, 1], [], []>} : vector<8x128xbf16>, vector<128x128xbf16>, vector<8x128xf32> -> vector<8x128xf32>
    %c0_4 = arith.constant 0 : index
    %c0_5 = arith.constant 0 : index
    %4 = vector.load %arg4[%c0_4, %c0_5] : memref<1x128xf32, #tpu.memory_space<vmem>>, vector<1x128xf32>
    %5 = vector.broadcast %4 : vector<1x128xf32> to vector<8x128xf32>
    %6 = arith.addf %3, %5 : vector<8x128xf32>
    %7 = math.tanh %6 : vector<8x128xf32>
    %c1_i32 = arith.constant 1 : i32
    %8 = arith.muli %arg0, %c1_i32 : i32
    %9 = tpu.iota {dimensions = array<i32: 0>} : vector<8x128xi32>
    %c0_i32 = arith.constant 0 : i32
    %10 = arith.addi %8, %c0_i32 : i32
    %11 = arith.index_cast %10 : i32 to index
    %12 = memref.load %arg1[%11] : memref<2xi32, #tpu.memory_space<smem>>
    %13 = vector.broadcast %12 : i32 to vector<8x128xi32>
    %14 = arith.cmpi slt, %9, %13 : vector<8x128xi32>
    %cst_6 = arith.constant 0.000000e+00 : f32
    %15 = vector.broadcast %cst_6 : f32 to vector<8x128xf32>
    %16 = arith.select %14, %7, %15 : vector<8x128xi1>, vector<8x128xf32>
    %cst_7 = arith.constant dense<0.000000e+00> : vector<128xf32>
    %17 = vector.multi_reduction <add>, %16, %cst_7 [0] : vector<8x128xf32> to vector<128xf32>
    %18 = vector.shape_cast %17 : vector<128xf32> to vector<1x128xf32>
    %19 = arith.sitofp %12 : i32 to f32
    %cst_8 = arith.constant 9.99999971E-10 : f32
    %20 = arith.maximumf %19, %cst_8 : f32
    %21 = vector.broadcast %20 : f32 to vector<1x128xf32>
    %22 = arith.divf %18, %21 : vector<1x128xf32>
    %c0_9 = arith.constant 0 : index
    %c0_10 = arith.constant 0 : index
    %c0_11 = arith.constant 0 : index
    %23 = vector.load %arg5[%c0_9, %c0_10, %c0_11] : memref<1x1x128xf32, #tpu.memory_space<vmem>>, vector<1x1x128xf32>
    %24 = vector.shape_cast %23 : vector<1x1x128xf32> to vector<1x128xf32>
    %25 = vector.shape_cast %22 : vector<1x128xf32> to vector<1x1x128xf32>
    tpu.vector_store %arg5[%c0_9, %c0_10, %c0_11], %25 {strides = array<i32>} : memref<1x1x128xf32, #tpu.memory_space<vmem>>, vector<1x1x128xf32>,
    return
  }
  func.func @transform_0(%arg0: i32, %arg1: memref<2xi32, #tpu.memory_space<smem>>) -> (i32, i32, i32) {
    %c0_i32 = arith.constant 0 : i32
    %c0_i32_0 = arith.constant 0 : i32
    %c0_i32_1 = arith.constant 0 : i32
    return %arg0, %c0_i32, %c0_i32_0 : i32, i32, i32
  }
  func.func @transform_1(%arg0: i32, %arg1: memref<2xi32, #tpu.memory_space<smem>>) -> (i32, i32) {
    %c0_i32 = arith.constant 0 : i32
    %c0_i32_0 = arith.constant 0 : i32
    %c0_i32_1 = arith.constant 0 : i32
    return %c0_i32, %c0_i32_0 : i32, i32
  }
  func.func @transform_2(%arg0: i32, %arg1: memref<2xi32, #tpu.memory_space<smem>>) -> (i32, i32) {
    %c0_i32 = arith.constant 0 : i32
    %c0_i32_0 = arith.constant 0 : i32
    %c0_i32_1 = arith.constant 0 : i32
    return %c0_i32, %c0_i32_0 : i32, i32
  }
  func.func @transform_3(%arg0: i32, %arg1: memref<2xi32, #tpu.memory_space<smem>>) -> (i32, i32, i32) {
    %c0_i32 = arith.constant 0 : i32
    %c0_i32_0 = arith.constant 0 : i32
    %c0_i32_1 = arith.constant 0 : i32
    return %arg0, %c0_i32, %c0_i32_0 : i32, i32, i32
  }
}

</mosaic_0001>

<bundles_post_ra>
// kernel: tpu_custom_call.1
= control target key start
LH: loop header
LB: loop body
LE: loop exit
PB: predicated region body
PF: predicated region fallthrough
CT: control target
= control target key end

     0   :  { %s943_s0 = inlined_call_operand.hbm [shape: s32[2], index: 0, kind: input, shape index: {}]   ;;  %s944_s1 = inlined_call_operand.hbm [shape: bf16[2,8,128], index: 1, kind: input, shape index: {}]   ;;  %s945_s2 = inlined_call_operand.hbm [shape: bf16[128,128], index: 2, kind: input, shape index: {}]   ;;  %s946_s3 = inlined_call_operand.vmem [shape: f32[1,128], index: 3, kind: input, shape index: {}]   ;;  %s947_s4 = inlined_call_operand.hbm [shape: f32[2,1,128], index: 4, kind: output, shape index: {}]  }
   0x1   :  { %s551_s17 = scalar_lea.hbm %s943_s0, 16 }
   0x2   :  { %p552_p0 = scmp.ne.s32.totalorder %s943_s0, %s551_s17  ;;  %p555_p1 = scmp.lt.u32.totalorder %s551_s17, %s943_s0 }
   0x4   :  { %p557_p2 = pnand %p555_p1, %p552_p0 }
   0x6   :  { %560 = shalt.err (!%p557_p2)  }
   0x7   :  { %s693_s22 = smov [#allocation3]  }
   0x8   :  { %10 = dma.hbm_to_smem %s943_s0, 16, %s693_s22, [#allocation2] }
   0x9   :  { %663 = dma.done.wait [#allocation2], 16 }
   0xa   :  { %664 = vsyncadd [#allocation2], 4294967280 }
   0xb   :  { %12 = sfence }
   0xc   :  { %13 = vsyncpa [#allocation5], 0 }
   0xd   :  { %15 = vsyncpa [#allocation5 + $0x1], 0 }
   0xe   :  { %16 = vsyncpa [#allocation8], 0 }
   0xf   :  { %17 = vsyncpa [#allocation6], 0 }
  0x10   :  { %19 = vsyncpa [#allocation6 + $0x1], 0  ;;  %s739_s25 = smov 0   ;;  %s741_s26 = smov 0  }
  0x11   :  { %s743_s27 = smov 0   ;;  %s745_s28 = smov 0  }
  0x12 LB: > { %s760_s0 = sadd.s32 4294967295, %s691_s28   ;;  %s426_s29 = sadd.s32 4294967294, %s691_s28   ;;  %s691_s28 = sphi %s745_s28, %s967_s28   ;;  %s687_s27 = sphi %s743_s27, %s966_s27   ;;  %s683_s26 = sphi %s741_s26, %s965_s26   ;;  %s679_s25 = sphi %s739_s25, %s964_s25  }
  0x13   : > { %p45_p3 = scmp.ne.s32.totalorder %s683_s26, %s679_s25  ;;  %p948_p4 = scmp.eq.s32.totalorder %s760_s0, 0 }
  0x14   : > { %p117_p6 = scmp.eq.s32.totalorder %s426_s29, 1  ;;  %p427_p8 = scmp.ge.s32.totalorder %s691_s28, 1 }
  0x15   : > { %p769_p7 = por %p948_p4, %p45_p3  ;;  %p124_p10 = scmp.lt.s32.totalorder %s691_s28, 3 }
  0x16   : > { %p774_p9 = por %p117_p6, %p45_p3  ;;  %s694_s7 = smov [#allocation7]  }
  0x17   : > { %s951_s30 = scalar_select %p769_p7, 1, 0 }
  0x18   : > { %s952_s5 = scalar_select %p774_p9, 1, 0 }
  0x19   : > { %p779_p11 = pnand %p427_p8, %p124_p10  ;;  %s136_s8 = sshll.u32 %s694_s7, 4  ;;  %s783_s8 = int_to_ptr.vmem [resolvable:$true] %s136_s8 }
  0x1a   : > { %s795_s10 = sadd.s32 1, %s691_s28   ;;  %s32_s11 = sadd.s32 1, %s687_s27 }
  0x1b   : > { %s953_s6 = scalar_select %p779_p11, 1, 0 }
  0x1c   : > { %p484_p12 = pneg %p779_p11  ;;  %s29_s12 = ssub.s32 %s691_s28, %s795_s10 }
  0x1d   : > { %s561_s15 = scalar_lea.hbm %s945_s2, 1024 }
  0x1e   : > { %p790_p0 = pnand %p484_p12, %p948_p4  ;;  %p562_p1 = scmp.ne.s32.totalorder %s945_s2, %s561_s15 }
  0x1f   : > { %p568_p8 = scmp.lt.u32.totalorder %s561_s15, %s945_s2 }
  0x20   : > { %p563_p2 = pneg %p790_p0 }
  0x22   : > { %p564_p3 = pnand %p563_p2, %p562_p1 }
  0x24   : > { %p565_p6 = pneg %p564_p3 }
  0x26   : > { %p570_p10 = pnand %p568_p8, %p565_p6 }
  0x28   : > { %573 = shalt.err (!%p570_p10)
}
  0x29   : > { %s574_s20 = scalar_lea.vmem %s783_s8, 1024  ;;  %p582_p5 = scmp.lt.s32.totalorder %s783_s8, %s783_s8 }
  0x2a   : > { %p575_p12 = scmp.ne.s32.totalorder %s783_s8, %s574_s20  ;;  %p583_p9 = scmp.lt.s32.totalorder %s574_s20, %s574_s20 }
  0x2c   : > { %p577_p13 = pnand %p575_p12, %p563_p2  ;;  %p584_p7 = por %p583_p9, %p582_p5 }
  0x2e   : > { %p578_p4 = pneg %p577_p13 }
  0x30   : > { %p585_p11 = pnand %p584_p7, %p578_p4 }
  0x32   : > { %588 = shalt.err (!%p585_p11)
}
  0x33   : > { %s695_s21 = smov 64   ;;  %s696_s22 = smov 4  }
  0x34   : > { %487 = dma.hbm_to_vmem [thread:$0]  (!%p790_p0), %s945_s2, 1024, %s783_s8, [#allocation8], %s695_s21, %s695_s21, %s696_s22  }
  0x35   : > { %p30_p5 = scmp.eq.s32.totalorder %s29_s12, 0  ;;  %p39_p4 = scmp.ne.s32.totalorder %s687_s27, %s683_s26 }
  0x36   : > { %p40_p7 = scmp.eq.s32.totalorder %s691_s28, 0  ;;  %p497_p9 = scmp.lt.s32.totalorder %s691_s28, 2 }
  0x37   : > { %s826_s29 = scalar_select %p30_p5, %s687_s27, %s32_s11  }
  0x38   : > { %p41_p11 = por %p40_p7, %p39_p4  ;;  %p955_p13 = scmp.eq.s32.totalorder %s760_s0, 1 }
  0x39   : > { %s153_s13 = sand.u32 1, %s687_s27   ;;  %s431_s14 = sshll.u32 %s691_s28, 6 }
  0x3a   : > { %p830_p1 = por %p955_p13, %p39_p4  ;;  %s430_s15 = sshll.u32 %s153_s13, 2 }
  0x3b   : > { %s839_s17 = scalar_lea.hbm %s944_s1, %s431_s14  ;;  %s157_s8 = scalar_lea.vmem [#allocation4], %s430_s15 }
  0x3c   : > { %s164_s11 = sshll.u32 %s157_s8, 4  ;;  %p841_p0 = pnand %p497_p9, %p41_p11  ;;  %s845_s11 = int_to_ptr.vmem [resolvable:$true] %s164_s11 }
  0x3d   : > { %s154_s18 = scalar_lea.sflag [#allocation5], %s153_s13  ;;  %s589_s19 = scalar_lea.hbm %s839_s17, 64 }
  0x3e   : > { %p590_p2 = scmp.ne.s32.totalorder %s839_s17, %s589_s19  ;;  %p591_p3 = pneg %p841_p0 }
  0x3f   : > { %s594_s22 = scalar_lea.hbm %s944_s1, 128  ;;  %p595_p10 = scmp.lt.u32.totalorder %s839_s17, %s944_s1 }
  0x40   : > { %p592_p6 = pnand %p591_p3, %p590_p2  ;;  %p596_p12 = scmp.lt.u32.totalorder %s594_s22, %s589_s19 }
  0x41   : > { %p598_p4 = scmp.lt.u32.totalorder %s589_s19, %s839_s17 }
  0x42   : > { %p593_p8 = pneg %p592_p6  ;;  %p597_p5 = por %p596_p12, %p595_p10 }
  0x44   : > { %p599_p7 = por %p598_p4, %p597_p5 }
  0x46   : > { %p600_p9 = pnand %p599_p7, %p593_p8 }
  0x48   : > { %603 = shalt.err (!%p600_p9)
}
  0x49   : > { %s604_s13 = scalar_lea.vmem %s845_s11, 64  ;;  %s697_s14 = smov [#allocation4]  }
  0x4a   : > { %p605_p11 = scmp.ne.s32.totalorder %s845_s11, %s604_s13  ;;  %s609_s15 = sshll.u32 %s697_s14, 4  ;;  %s610_s15 = int_to_ptr.vmem [resolvable:$false] %s609_s15 }
  0x4b   : > { %s611_s9 = scalar_lea.vmem %s610_s15, 128  ;;  %p612_p6 = scmp.lt.s32.totalorder %s845_s11, %s610_s15 }
  0x4c   : > { %p607_p13 = pnand %p605_p11, %p591_p3  ;;  %p613_p10 = scmp.lt.s32.totalorder %s611_s9, %s604_s13 }
  0x4e   : > { %p608_p2 = pneg %p607_p13  ;;  %p614_p12 = por %p613_p10, %p612_p6 }
  0x50   : > { %p615_p5 = pnand %p614_p12, %p608_p2 }
  0x52   : > { %618 = shalt.err (!%p615_p5)
}
  0x53   : > { %491 = dma.hbm_to_vmem [thread:$0]  (!%p841_p0), %s839_s17, 64, %s845_s11, %s154_s18  }
  0x54   : > { %p958_p8 = scmp.ne.s32.totalorder %s953_s6, 0 }
  0x55   : > { %s875_s16 = sand.u32 (!%p958_p8), 1, %s683_s26   ;;  %p959_p3 = scmp.ne.s32.totalorder (!%p958_p8), %s951_s30, 0 }
  0x56   : > { %173 = sbr.rel (%p958_p8) target bundleno = 384 (0x180), region = 32  ;;  %s433_s8 = sshll.u32 (!%p958_p8), %s875_s16, 2 }
  0x57   : > { %s176_s19 = scalar_lea.sflag (!%p958_p8), [#allocation5], %s875_s16  ;;  %s879_s20 = scalar_lea.vmem (!%p958_p8), [#allocation4], %s433_s8 }
  0x5d   : > { %666 = dma.done.wait (%p959_p3), %s176_s19, 64  }
  0x5e   : > { %668 = vsyncadd (%p959_p3), %s176_s19, 4294967232  ;;  %p960_p0 = scmp.eq.s32.totalorder %s760_s0, 0 }
  0x60   : > { %670 = dma.done.wait (%p960_p0), [#allocation8], 1024   ;;  %p961_p4 = pmov %p960_p0 }
  0x61   : > { %v698_v0 = vmov 0.0   ;;  %vm699_vm0 = vmmov 0   ;;  %v539_v1 = vld [vmem:[#allocation7] sm:$0xff]   ;;  %v540_v2 = vld [vmem:[#allocation7 + $0x8] sm:$0xff]   ;;  %v541_v3 = vld [vmem:[#allocation7 + $0x10] sm:$0xff]   ;;  %s321_s30 = sld [smem:[#allocation3 + %s760_s0]]  ;;  %v319_v15 = vlaneseq }
  0x62   : > { %672 = vsyncadd (%p961_p4), [#allocation8], 4294966272  ;;  %456 = vmatprep.subr.bf16.mxu0 %v698_v0  ;;  %472 = vmatprep.mubr.msk.bf16.mxu0 %vm699_vm0, %v698_v0  ;;  %v542_v4 = vld [vmem:[#allocation7 + $0x18] sm:$0xff]   ;;  %v543_v5 = vld [vmem:[#allocation7 + $0x20] sm:$0xff]   ;;  %s700_s12 = smov 1e-09  }
  0x63   : > { %457 = vmatpush3.bf16.msra.mxu0 %v539_v1  ;;  %v544_v6 = vld [vmem:[#allocation7 + $0x28] sm:$0xff]   ;;  %v545_v7 = vld [vmem:[#allocation7 + $0x30] sm:$0xff]   ;;  %v546_v8 = vld [vmem:[#allocation7 + $0x38] sm:$0xff]   ;;  %v320_v17 = vshrl.u32 %v319_v15, 7  ;;  %s444_s21 = sshll.u32 %s760_s0, 4  ;;  %s204_s22 = scalar_lea.vmem [#allocation9], %s875_s16 }
  0x64   : > { %458 = vmatprep.subr.bf16.mxu0 %v698_v0  ;;  %v206_v9 = vld [vmem:[%s879_s20] sm:$0xf]  ;;  %s350_s23 = sshll.u32 %s204_s22, 4  ;;  %s899_s14 = scalar_lea.hbm %s947_s4, %s444_s21  ;;  %s901_s23 = int_to_ptr.vmem [resolvable:$true] %s350_s23 }
  0x65   : > { %v435_v10 = vld [vmem:[%s946_s3] ss:$0 sm:$0xff]  ;;  %s338_s15 = scalar_lea.sflag [#allocation6], %s875_s16  ;;  %s619_s9 = scalar_lea.vmem %s901_s23, 16 }
  0x66   : > { %p620_p7 = scmp.ne.s32.totalorder %s901_s23, %s619_s9  ;;  %s701_s0 = smov [#allocation9]  }
  0x67   : > { %459 = vmatpush3.bf16.msra.mxu0 %v540_v2  ;;  %s331_s11 = scvt.s32.f32 %s321_s30  ;;  %v322_v18 = vstv %s321_s30  ;;  %s623_s8 = sshll.u32 %s701_s0, 4  ;;  %s624_s8 = int_to_ptr.vmem [resolvable:$false] %s623_s8 }
  0x68   : > { %460 = vmatprep.subr.bf16.mxu0 %v698_v0  ;;  %vm323_vm1 = vcmp.lt.s32.totalorder %v320_v17, %v322_v18  ;;  %p621_p9 = pnand %p620_p7, %p830_p1  ;;  %s625_s19 = scalar_lea.vmem %s624_s8, 32 }
  0x69   : > { %s332_s18 = smax.f32 %s700_s12, %s331_s11  ;;  %p626_p13 = scmp.lt.s32.totalorder %s901_s23, %s624_s8 }
  0x6a   : > { %v333_v19 = vstv %s332_s18  ;;  %p622_p11 = pneg %p621_p9  ;;  %p627_p2 = scmp.lt.s32.totalorder %s625_s19, %s619_s9 }
  0x6b   : > { %461 = vmatpush3.bf16.msra.mxu0 %v541_v3 }
  0x6c   : > { %462 = vmatprep.subr.bf16.mxu0 %v698_v0  ;;  %p628_p6 = por %p627_p2, %p626_p13 }
  0x6e   : > { %p629_p10 = pnand %p628_p6, %p622_p11 }
  0x6f   : > { %463 = vmatpush3.bf16.msra.mxu0 %v542_v4 }
  0x70   : > { %464 = vmatprep.subr.bf16.mxu0 %v698_v0 }
  0x73   : > { %465 = vmatpush3.bf16.msra.mxu0 %v543_v5 }
  0x74   : > { %466 = vmatprep.subr.bf16.mxu0 %v698_v0 }
  0x77   : > { %467 = vmatpush3.bf16.msra.mxu0 %v544_v6 }
  0x78   : > { %468 = vmatprep.subr.bf16.mxu0 %v698_v0 }
  0x7b   : > { %469 = vmatpush3.bf16.msra.mxu0 %v545_v7 }
  0x7c   : > { %470 = vmatprep.subr.bf16.mxu0 %v698_v0 }
  0x7f   : > { %471 = vmatpush3.bf16.msra.mxu0 %v546_v8 }
  0x82   : > { %473 = vmatmul.mubr.bf16.vlgmr.msra.gmra.mrb[0].mxu0 %v206_v9 }
 0x155   : > { %v312_v11 = vpop.f32.mrb[0].mxu0 }
 0x156   : > { %v313_v12 = vadd.f32 %v435_v10, %v312_v11  ;;  %v474_v13 = vpop.f32.mrb[1].mxu0 }
 0x157   : > { %v315_v14 = vpop.f32.mrb[2].mxu0 }
 0x158   : > { %547 = vtanh.f32 %v313_v12  ;;  %v475_v16 = vpop.f32.mrb[3].mxu0 }
 0x159   : > { %549 = vrcp.f32 %v333_v19 }
 0x162   : > { %v548_v20 = vpop.eup %547 }
 0x163   : > { %v324_v21 = vsel %vm323_vm1, %v548_v20, 0.0  ;;  %v550_v27 = vpop.eup %549 }
 0x164   : > { %v325_v22 = vrot.slane %v324_v21, 4 }
 0x166   : > { %v326_v23 = vadd.f32 %v325_v22, %v324_v21 }
 0x168   : > { %v327_v24 = vrot.slane %v326_v23, 2 }
 0x16a   : > { %v328_v25 = vadd.f32 %v327_v24, %v326_v23 }
 0x16c   : > { %v329_v26 = vrot.slane %v328_v25, 1 }
 0x16e   : > { %v330_v28 = vadd.f32 %v329_v26, %v328_v25 }
 0x170   : > { %v335_v29 = vmul.f32 %v550_v27, %v330_v28 }
 0x172   : > { %336 = vst [vmem:[%s204_s22] sm:$0x1] %v335_v29 }
 0x173   : > { %632 = shalt.err (!%p629_p10)
}
 0x174   : > { %s633_s16 = scalar_lea.hbm %s899_s14, 16  ;;  %s637_s6 = scalar_lea.hbm %s947_s4, 32 }
 0x175   : > { %p634_p12 = scmp.ne.s32.totalorder %s899_s14, %s633_s16  ;;  %p638_p3 = scmp.lt.u32.totalorder %s899_s14, %s947_s4 }
 0x176   : > { %p639_p0 = scmp.lt.u32.totalorder %s637_s6, %s633_s16  ;;  %p641_p7 = scmp.lt.u32.totalorder %s633_s16, %s899_s14 }
 0x177   : > { %p635_p5 = pnand %p634_p12, %p830_p1 }
 0x178   : > { %p640_p4 = por %p639_p0, %p638_p3 }
 0x179   : > { %p636_p8 = pneg %p635_p5 }
 0x17a   : > { %p642_p9 = por %p641_p7, %p640_p4 }
 0x17c   : > { %p643_p11 = pnand %p642_p9, %p636_p8 }
 0x17e   : > { %646 = shalt.err (!%p643_p11)
}
 0x17f   : > { %482 = dma.vmem_to_hbm [thread:$0]  (%p830_p1), %s901_s23, 16, %s899_s14, %s338_s15  }
 0x180 PF: > { %s362_s12 = sand.u32 1, %s679_s25   ;;  %p962_p13 = scmp.ne.s32.totalorder %s952_s5, 0 }
 0x181   : > { %p963_p2 = scmp.ge.s32.totalorder %s691_s28, 2  ;;  %s363_s18 = scalar_lea.sflag [#allocation6], %s362_s12 }
 0x183   : > { %p493_p6 = pnand %p963_p2, %p962_p13 }
 0x185   : > { %674 = dma.done.wait (!%p493_p6), %s363_s18, 16  }
 0x186   : > { %676 = vsyncadd (!%p493_p6), %s363_s18, 4294967280  ;;  %p22_p10 = scmp.ge.s32.totalorder %s795_s10, 4   ;;  %s964_s25 = smov %s683_s26 }
 0x187   : > { %s965_s26 = smov %s687_s27  ;;  %s966_s27 = smov %s826_s29 }
 0x188   : > { %s967_s28 = smov %s795_s10  ;;  %24 = sbr.rel (!%p22_p10) target bundleno = 18 (0x12), region = 81 }
 0x18f   :  { %367 = vsyncpa [#allocation5], 1 }
 0x190   :  { %369 = vsyncpa [#allocation5 + $0x1], 1 }
 0x191   :  { %370 = vsyncpa [#allocation8], 1 }
 0x192   :  { %371 = vsyncpa [#allocation6], 1 }
 0x193   :  { %373 = vsyncpa [#allocation6 + $0x1], 1 }

</bundles_post_ra>
